<compile_context>
chip_gen: v7x
topology: tpu7x:2x2x1
jax: 0.10.0
libtpu: 0.0.40
codegen_flags: <defaults>
</compile_context>

<pallas_src>
import math
import numpy as np
import jax
import jax.numpy as jnp
from jax.experimental import pallas as pl
from jax.experimental.pallas import tpu as pltpu


_PI = math.pi
_PI_2 = math.pi / 2.0
_PI_4 = math.pi / 4.0
_TAN_PI_8 = 0.4142135623730951  # tan(pi/8) = sqrt(2) - 1


def _atan2(y, x):
    """Branchless float32 atan2(y, x): VPU ops + EUP approx reciprocals only.

    Cephes-style atan polynomial; matches jnp.angle(re + i*im) to ~1e-3 rad
    (approx reciprocal), identical everywhere except exactly on the +/-pi
    branch cut, where +pi and -pi denote the same angle.
    """
    ay = jnp.abs(y)
    ax = jnp.abs(x)
    num = jnp.minimum(ay, ax)
    den = jnp.maximum(ay, ax)
    den = jnp.where(den == 0.0, 1.0, den)                    # atan2(0, 0) -> 0
    # EUP (otherwise idle) approx reciprocals instead of multi-op VALU divides.
    t = num * pl.reciprocal(den, approx=True)                # t in [0, 1]
    hi = t > _TAN_PI_8
    # atan(t) = pi/4 + atan((t-1)/(t+1)) reduces argument to |z| <= tan(pi/8)
    z = jnp.where(hi, (t - 1.0) * pl.reciprocal(t + 1.0, approx=True), t)
    base = jnp.where(hi, _PI_4, 0.0)
    z2 = z * z
    p = ((8.05374449538e-2 * z2 - 1.38776856032e-1) * z2
         + 1.99777106478e-1) * z2 - 3.33329491539e-1
    a = base + z + z * z2 * p                                # atan(t) in [0, pi/4]
    a = jnp.where(ay > ax, _PI_2 - a, a)                     # reflect -> [0, pi/2]
    a = jnp.where(x < 0.0, _PI - a, a)                       # quadrants II / III
    return jnp.where(y < 0.0, -a, a)                         # lower half-plane


def freblock_kernel(x_ref, w_ref, b_ref, fre_ref, fim_ref, amp_ref, pha_ref):
    # x_ref:   (1, Mb, H*W)   rows are (batch, channel) pairs of this grid block
    # w_ref:   (Mb, Mb)       block-diagonal 1x1-conv weight = kron(I_batches, W)
    # b_ref:   (Mb, 1)        conv bias with the +1e-8 folded in
    # fre/fim: (H*W, H*Wrp)   dense 2D rfft matrix (real / imag), lane-padded
    # No in-kernel reshapes / broadcasts: three lane-dense MXU matmuls + one VPU pass.
    y = jnp.dot(w_ref[...], x_ref[0], preferred_element_type=jnp.float32)
    y = y + b_ref[...]                                       # (Mb, H*W)

    z_re = jnp.dot(y, fre_ref[...], preferred_element_type=jnp.float32)  # (Mb, H*Wrp)
    z_im = jnp.dot(y, fim_ref[...], preferred_element_type=jnp.float32)  # (Mb, H*Wrp)

    amp_ref[0] = jnp.sqrt(z_re * z_re + z_im * z_im)
    pha_ref[0] = _atan2(z_im, z_re)                          # torch.angle == atan2(im, re)


def _rfft2_matrices(H, W, Wrp):
    """Dense 2D real-DFT matrices (real, imag) of shape (H*W, H*Wrp).

    Row index = h*W + w (row-major flatten of the spatial dims); column index
    = ho*Wrp + wo with wo < Wr = W//2 + 1; columns Wr..Wrp-1 are zero padding
    so the output's lane dimension is a multiple of 128.
    """
    Wr = W // 2 + 1
    ph_h = np.exp(-2j * np.pi * np.outer(np.arange(H), np.arange(H)) / H)    # (H, H)
    ph_w = np.exp(-2j * np.pi * np.outer(np.arange(W), np.arange(Wr)) / W)   # (W, Wr)
    F = np.einsum('ha,wb->hwab', ph_h, ph_w).reshape(H * W, H * Wr)
    if Wrp != Wr:
        Fp = np.zeros((H * W, H * Wrp), dtype=np.complex128)
        Fp.reshape(H * W, H, Wrp)[:, :, :Wr] = F.reshape(H * W, H, Wr)
        F = Fp
    return (jnp.asarray(F.real, jnp.float32), jnp.asarray(F.imag, jnp.float32))


def _num_row_blocks(B):
    """Grid width: 1 step on single-TC chips (v5e/v6e); 2 parallel steps on dual-TC v7x."""
    try:
        kind = jax.devices()[0].device_kind.lower()
    except Exception:
        return 1
    if "v7" in kind and B % 2 == 0:
        return 2
    return 1


def freblock_forward(x, conv_w, conv_b, num_row_blocks=None):
    """x: (B, C, H, W) f32; conv_w: (C, C) (1x1 conv weight squeezed); conv_b: (C,)."""
    B, C, H, W = x.shape
    Wr = W // 2 + 1

    # Pad the rfft width so the output's last (lane) dim H*Wrp is a multiple of 128
    # -> unmasked, lane-dense vst. Fall back to no padding if that would over-pad.
    Wrp = Wr
    for cand in range(Wr, 2 * Wr + 1):
        if (H * cand) % 128 == 0:
            Wrp = cand
            break

    fre, fim = _rfft2_matrices(H, W, Wrp)

    G = num_row_blocks if num_row_blocks is not None else _num_row_blocks(B)
    assert B % G == 0, "grid width must divide the batch"
    Bg = B // G                      # batch elements per grid block
    Mb = Bg * C                      # matmul rows per grid block

    # 1x1 conv over the folded (batch, channel) rows = one block-diagonal matmul.
    w_bd = jnp.kron(jnp.eye(Bg, dtype=jnp.float32), conv_w.astype(jnp.float32))  # (Mb, Mb)
    # Fold the +1e-8 into the bias (removes a full-tile VPU pass in the kernel).
    b_blk = jnp.tile(conv_b.astype(jnp.float32) + 1e-8, Bg).reshape(Mb, 1)

    # Layout work stays in the wrapper: contiguous reshape only, no transposes.
    x3 = x.astype(jnp.float32).reshape(G, Mb, H * W)

    out_shape = (jax.ShapeDtypeStruct((G, Mb, H * Wrp), jnp.float32),   # amp (flat, padded)
                 jax.ShapeDtypeStruct((G, Mb, H * Wrp), jnp.float32))   # pha (flat, padded)

    grid_spec = pltpu.PrefetchScalarGridSpec(
        num_scalar_prefetch=0,
        grid=(G,),
        in_specs=[
            pl.BlockSpec((1, Mb, H * W), lambda g: (g, 0, 0)),        # x rows for this block
            pl.BlockSpec((Mb, Mb), lambda g: (0, 0)),                 # block-diag conv weight
            pl.BlockSpec((Mb, 1), lambda g: (0, 0)),                  # bias (+1e-8)
            pl.BlockSpec((H * W, H * Wrp), lambda g: (0, 0)),         # F real
            pl.BlockSpec((H * W, H * Wrp), lambda g: (0, 0)),         # F imag
        ],
        out_specs=[pl.BlockSpec((1, Mb, H * Wrp), lambda g: (g, 0, 0))] * 2,
    )

    flops = (2 * G * Mb * Mb * H * W                      # block-diag conv matmul
             + 2 * 2 * (B * C) * (H * W) * (H * Wrp))     # two DFT matmuls
    transcendentals = 3 * (B * C) * H * Wrp               # sqrt + 2 approx reciprocals
    bytes_accessed = 4 * (B * C * H * W + Mb * Mb + Mb
                          + 2 * (H * W) * (H * Wrp) + 2 * (B * C) * H * Wrp)

    amp3, pha3 = pl.pallas_call(
        freblock_kernel,
        out_shape=out_shape,
        grid_spec=grid_spec,
        compiler_params=pltpu.CompilerParams(dimension_semantics=("parallel",)),
        cost_estimate=pl.CostEstimate(flops=flops,
                                      transcendentals=transcendentals,
                                      bytes_accessed=bytes_accessed),
    )(x3, w_bd, b_blk, fre, fim)

    # Contiguous reshape back to PyTorch layout + drop the lane padding.
    amp = amp3.reshape(B, C, H, Wrp)[..., :Wr]
    pha = pha3.reshape(B, C, H, Wrp)[..., :Wr]
    return amp, pha


if __name__ == "__main__":
    B, C, H, W = 2, 4, 16, 16
    key = jax.random.PRNGKey(0)
    kx, kw, kb = jax.random.split(key, 3)

    x = jax.random.normal(kx, (B, C, H, W), dtype=jnp.float32)
    # Deterministic "Conv2d(channels, channels, 1)" params, PyTorch-style uniform init.
    bound = 1.0 / np.sqrt(C)
    conv_w = jax.random.uniform(kw, (C, C), jnp.float32, -bound, bound)
    conv_b = jax.random.uniform(kb, (C,), jnp.float32, -bound, bound)

    amp, pha = freblock_forward(x, conv_w, conv_b)
    amp, pha = jax.block_until_ready((amp, pha))

    # Pure-JAX reference of the same forward.
    y_ref = jnp.einsum('oc,bchw->bohw', conv_w, x) + conv_b[None, :, None, None]
    freq = jnp.fft.rfft2(y_ref + 1e-8)
    amp_ref = np.asarray(jnp.abs(freq))
    pha_ref = np.asarray(jnp.angle(freq))

    assert amp.shape == (B, C, H, W // 2 + 1) and pha.shape == amp.shape
    np.testing.assert_allclose(np.asarray(amp), amp_ref, rtol=2e-3, atol=2e-3)

    # Phase is an angle: compare circularly (pi and -pi are the same phase) and only
    # where the magnitude is non-negligible (phase is ill-conditioned near 0). Slightly
    # wider tolerance than before because the atan2 divides use EUP approx reciprocals.
    mask = amp_ref > 1e-2
    dphi = np.asarray(pha) - pha_ref
    dphi = (dphi + np.pi) % (2.0 * np.pi) - np.pi          # wrap difference into (-pi, pi]
    np.testing.assert_allclose(dphi[mask], 0.0, atol=5e-3)

    print("KERNEL_OK")
</pallas_src>

<mosaic_0001>
module attributes {stable_mosaic.version = 11 : i64} {
  func.func @freblock_kernel(%arg0: i32, %arg1: memref<1x8x256xf32, #tpu.memory_space<vmem>>, %arg2: memref<8x8xf32, #tpu.memory_space<vmem>>, %arg3: memref<8x1xf32, #tpu.memory_space<vmem>>, %arg4: memref<256x256xf32, #tpu.memory_space<vmem>>, %arg5: memref<256x256xf32, #tpu.memory_space<vmem>>, %arg6: memref<1x8x256xf32, #tpu.memory_space<vmem>>, %arg7: memref<1x8x256xf32, #tpu.memory_space<vmem>>) attributes {dimension_semantics = [#tpu.dimension_semantics<parallel>], iteration_bounds = array<i64: 1>, scalar_prefetch = 0 : i64, scratch_operands = 0 : i64, tpu.core_type = #tpu.core_type<tc>, window_params = [{transform_indices = @transform_0, window_bounds = array<i64: 1, 8, 256>}, {pipeline_mode = #tpu.pipeline_mode<synchronous>, transform_indices = @transform_1, window_bounds = array<i64: 8, 8>}, {pipeline_mode = #tpu.pipeline_mode<synchronous>, transform_indices = @transform_2, window_bounds = array<i64: 8, 1>}, {pipeline_mode = #tpu.pipeline_mode<synchronous>, transform_indices = @transform_3, window_bounds = array<i64: 256, 256>}, {pipeline_mode = #tpu.pipeline_mode<synchronous>, transform_indices = @transform_4, window_bounds = array<i64: 256, 256>}, {transform_indices = @transform_5, window_bounds = array<i64: 1, 8, 256>}, {transform_indices = @transform_6, window_bounds = array<i64: 1, 8, 256>}]} {
    %c0 = arith.constant 0 : index
    %c0_0 = arith.constant 0 : index
    %0 = vector.load %arg2[%c0, %c0_0] : memref<8x8xf32, #tpu.memory_space<vmem>>, vector<8x8xf32>
    %c0_1 = arith.constant 0 : index
    %c0_2 = arith.constant 0 : index
    %c0_3 = arith.constant 0 : index
    %1 = vector.load %arg1[%c0_1, %c0_2, %c0_3] : memref<1x8x256xf32, #tpu.memory_space<vmem>>, vector<1x8x256xf32>
    %2 = vector.shape_cast %1 : vector<1x8x256xf32> to vector<8x256xf32>
    %cst = arith.constant dense<0.000000e+00> : vector<8x256xf32>
    %3 = tpu.matmul %0, %2, %cst {dimension_numbers = #tpu.dot_dimension_numbers<[1], [0], [0], [1], [0, 0, 1, 1], [], []>} : vector<8x8xf32>, vector<8x256xf32>, vector<8x256xf32> -> vector<8x256xf32>
    %c0_4 = arith.constant 0 : index
    %c0_5 = arith.constant 0 : index
    %4 = vector.load %arg3[%c0_4, %c0_5] : memref<8x1xf32, #tpu.memory_space<vmem>>, vector<8x1xf32>
    %5 = vector.broadcast %4 : vector<8x1xf32> to vector<8x256xf32>
    %6 = arith.addf %3, %5 : vector<8x256xf32>
    %c0_6 = arith.constant 0 : index
    %c0_7 = arith.constant 0 : index
    %7 = vector.load %arg4[%c0_6, %c0_7] : memref<256x256xf32, #tpu.memory_space<vmem>>, vector<256x256xf32>
    %cst_8 = arith.constant dense<0.000000e+00> : vector<8x256xf32>
    %8 = tpu.matmul %6, %7, %cst_8 {dimension_numbers = #tpu.dot_dimension_numbers<[1], [0], [0], [1], [0, 0, 1, 1], [], []>} : vector<8x256xf32>, vector<256x256xf32>, vector<8x256xf32> -> vector<8x256xf32>
    %c0_9 = arith.constant 0 : index
    %c0_10 = arith.constant 0 : index
    %9 = vector.load %arg5[%c0_9, %c0_10] : memref<256x256xf32, #tpu.memory_space<vmem>>, vector<256x256xf32>
    %cst_11 = arith.constant dense<0.000000e+00> : vector<8x256xf32>
    %10 = tpu.matmul %6, %9, %cst_11 {dimension_numbers = #tpu.dot_dimension_numbers<[1], [0], [0], [1], [0, 0, 1, 1], [], []>} : vector<8x256xf32>, vector<256x256xf32>, vector<8x256xf32> -> vector<8x256xf32>
    %11 = arith.mulf %8, %8 : vector<8x256xf32>
    %12 = arith.mulf %10, %10 : vector<8x256xf32>
    %13 = arith.addf %11, %12 : vector<8x256xf32>
    %14 = math.sqrt %13 : vector<8x256xf32>
    %c0_12 = arith.constant 0 : index
    %c0_13 = arith.constant 0 : index
    %c0_14 = arith.constant 0 : index
    %15 = vector.load %arg6[%c0_12, %c0_13, %c0_14] : memref<1x8x256xf32, #tpu.memory_space<vmem>>, vector<1x8x256xf32>
    %16 = vector.shape_cast %15 : vector<1x8x256xf32> to vector<8x256xf32>
    %17 = vector.shape_cast %14 : vector<8x256xf32> to vector<1x8x256xf32>
    tpu.vector_store %arg6[%c0_12, %c0_13, %c0_14], %17 {strides = array<i32>} : memref<1x8x256xf32, #tpu.memory_space<vmem>>, vector<1x8x256xf32>,
    %18 = math.absf %10 : vector<8x256xf32>
    %19 = math.absf %8 : vector<8x256xf32>
    %20 = arith.minimumf %18, %19 : vector<8x256xf32>
    %21 = arith.maximumf %18, %19 : vector<8x256xf32>
    %cst_15 = arith.constant 0.000000e+00 : f32
    %22 = vector.broadcast %cst_15 : f32 to vector<8x256xf32>
    %23 = arith.cmpf oeq, %21, %22 : vector<8x256xf32>
    %cst_16 = arith.constant 1.000000e+00 : f32
    %24 = vector.broadcast %cst_16 : f32 to vector<8x256xf32>
    %25 = arith.select %23, %24, %21 : vector<8x256xi1>, vector<8x256xf32>
    %26 = tpu.reciprocal %25 {approx = true} : vector<8x256xf32> -> vector<8x256xf32>
    %27 = arith.mulf %20, %26 : vector<8x256xf32>
    %cst_17 = arith.constant 0.414213568 : f32
    %28 = vector.broadcast %cst_17 : f32 to vector<8x256xf32>
    %29 = arith.cmpf ogt, %27, %28 : vector<8x256xf32>
    %cst_18 = arith.constant 1.000000e+00 : f32
    %30 = vector.broadcast %cst_18 : f32 to vector<8x256xf32>
    %31 = arith.subf %27, %30 : vector<8x256xf32>
    %cst_19 = arith.constant 1.000000e+00 : f32
    %32 = vector.broadcast %cst_19 : f32 to vector<8x256xf32>
    %33 = arith.addf %27, %32 : vector<8x256xf32>
    %34 = tpu.reciprocal %33 {approx = true} : vector<8x256xf32> -> vector<8x256xf32>
    %35 = arith.mulf %31, %34 : vector<8x256xf32>
    %36 = arith.select %29, %35, %27 : vector<8x256xi1>, vector<8x256xf32>
    %cst_20 = arith.constant 0.785398185 : f32
    %cst_21 = arith.constant 0.000000e+00 : f32
    %37 = vector.broadcast %cst_20 : f32 to vector<8x256xf32>
    %38 = vector.broadcast %cst_21 : f32 to vector<8x256xf32>
    %39 = arith.select %29, %37, %38 : vector<8x256xi1>, vector<8x256xf32>
    %40 = arith.mulf %36, %36 : vector<8x256xf32>
    %cst_22 = arith.constant 0.0805374458 : f32
    %41 = vector.broadcast %cst_22 : f32 to vector<8x256xf32>
    %42 = arith.mulf %41, %40 : vector<8x256xf32>
    %cst_23 = arith.constant 0.138776854 : f32
    %43 = vector.broadcast %cst_23 : f32 to vector<8x256xf32>
    %44 = arith.subf %42, %43 : vector<8x256xf32>
    %45 = arith.mulf %44, %40 : vector<8x256xf32>
    %cst_24 = arith.constant 0.199777111 : f32
    %46 = vector.broadcast %cst_24 : f32 to vector<8x256xf32>
    %47 = arith.addf %45, %46 : vector<8x256xf32>
    %48 = arith.mulf %47, %40 : vector<8x256xf32>
    %cst_25 = arith.constant 0.333329499 : f32
    %49 = vector.broadcast %cst_25 : f32 to vector<8x256xf32>
    %50 = arith.subf %48, %49 : vector<8x256xf32>
    %51 = arith.addf %39, %36 : vector<8x256xf32>
    %52 = arith.mulf %36, %40 : vector<8x256xf32>
    %53 = arith.mulf %52, %50 : vector<8x256xf32>
    %54 = arith.addf %51, %53 : vector<8x256xf32>
    %55 = arith.cmpf ogt, %18, %19 : vector<8x256xf32>
    %cst_26 = arith.constant 1.57079637 : f32
    %56 = vector.broadcast %cst_26 : f32 to vector<8x256xf32>
    %57 = arith.subf %56, %54 : vector<8x256xf32>
    %58 = arith.select %55, %57, %54 : vector<8x256xi1>, vector<8x256xf32>
    %cst_27 = arith.constant 0.000000e+00 : f32
    %59 = vector.broadcast %cst_27 : f32 to vector<8x256xf32>
    %60 = arith.cmpf olt, %8, %59 : vector<8x256xf32>
    %cst_28 = arith.constant 3.14159274 : f32
    %61 = vector.broadcast %cst_28 : f32 to vector<8x256xf32>
    %62 = arith.subf %61, %58 : vector<8x256xf32>
    %63 = arith.select %60, %62, %58 : vector<8x256xi1>, vector<8x256xf32>
    %cst_29 = arith.constant 0.000000e+00 : f32
    %64 = vector.broadcast %cst_29 : f32 to vector<8x256xf32>
    %65 = arith.cmpf olt, %10, %64 : vector<8x256xf32>
    %cst_30 = arith.constant 0.000000e+00 : f32
    %66 = vector.broadcast %cst_30 : f32 to vector<8x256xf32>
    %67 = arith.subf %66, %63 : vector<8x256xf32>
    %68 = arith.select %65, %67, %63 : vector<8x256xi1>, vector<8x256xf32>
    %c0_31 = arith.constant 0 : index
    %c0_32 = arith.constant 0 : index
    %c0_33 = arith.constant 0 : index
    %69 = vector.load %arg7[%c0_31, %c0_32, %c0_33] : memref<1x8x256xf32, #tpu.memory_space<vmem>>, vector<1x8x256xf32>
    %70 = vector.shape_cast %69 : vector<1x8x256xf32> to vector<8x256xf32>
    %71 = vector.shape_cast %68 : vector<8x256xf32> to vector<1x8x256xf32>
    tpu.vector_store %arg7[%c0_31, %c0_32, %c0_33], %71 {strides = array<i32>} : memref<1x8x256xf32, #tpu.memory_space<vmem>>, vector<1x8x256xf32>,
    return
  }
  func.func @transform_0(%arg0: i32) -> (i32, i32, i32) {
    %c0_i32 = arith.constant 0 : i32
    %c0_i32_0 = arith.constant 0 : i32
    %c0_i32_1 = arith.constant 0 : i32
    return %arg0, %c0_i32, %c0_i32_0 : i32, i32, i32
  }
  func.func @transform_1(%arg0: i32) -> (i32, i32) {
    %c0_i32 = arith.constant 0 : i32
    %c0_i32_0 = arith.constant 0 : i32
    %c0_i32_1 = arith.constant 0 : i32
    return %c0_i32, %c0_i32_0 : i32, i32
  }
  func.func @transform_2(%arg0: i32) -> (i32, i32) {
    %c0_i32 = arith.constant 0 : i32
    %c0_i32_0 = arith.constant 0 : i32
    %c0_i32_1 = arith.constant 0 : i32
    return %c0_i32, %c0_i32_0 : i32, i32
  }
  func.func @transform_3(%arg0: i32) -> (i32, i32) {
    %c0_i32 = arith.constant 0 : i32
    %c0_i32_0 = arith.constant 0 : i32
    %c0_i32_1 = arith.constant 0 : i32
    return %c0_i32, %c0_i32_0 : i32, i32
  }
  func.func @transform_4(%arg0: i32) -> (i32, i32) {
    %c0_i32 = arith.constant 0 : i32
    %c0_i32_0 = arith.constant 0 : i32
    %c0_i32_1 = arith.constant 0 : i32
    return %c0_i32, %c0_i32_0 : i32, i32
  }
  func.func @transform_5(%arg0: i32) -> (i32, i32, i32) {
    %c0_i32 = arith.constant 0 : i32
    %c0_i32_0 = arith.constant 0 : i32
    %c0_i32_1 = arith.constant 0 : i32
    return %arg0, %c0_i32, %c0_i32_0 : i32, i32, i32
  }
  func.func @transform_6(%arg0: i32) -> (i32, i32, i32) {
    %c0_i32 = arith.constant 0 : i32
    %c0_i32_0 = arith.constant 0 : i32
    %c0_i32_1 = arith.constant 0 : i32
    return %arg0, %c0_i32, %c0_i32_0 : i32, i32, i32
  }
}

</mosaic_0001>

<bundles_post_ra>
// kernel: tpu_custom_call.1
= control target key start
LH: loop header
LB: loop body
LE: loop exit
PB: predicated region body
PF: predicated region fallthrough
CT: control target
= control target key end

     0   :  { %12 = vsyncpa [#allocation3], 0  ;;  %s989_s0 = inlined_call_operand.hbm [shape: f32[1,8,256], index: 0, kind: input, shape index: {}]   ;;  %s990_s1 = inlined_call_operand.vmem [shape: f32[8,8], index: 1, kind: input, shape index: {}]   ;;  %s991_s2 = inlined_call_operand.vmem [shape: f32[8,1], index: 2, kind: input, shape index: {}]   ;;  %s992_s3 = inlined_call_operand.hbm [shape: f32[256,256], index: 3, kind: input, shape index: {}]   ;;  %s993_s4 = inlined_call_operand.hbm [shape: f32[256,256], index: 4, kind: input, shape index: {}]   ;;  %s994_s5 = inlined_call_operand.hbm [shape: f32[1,8,256], index: 5, kind: output, shape index: {0}]   ;;  %s995_s6 = inlined_call_operand.hbm [shape: f32[1,8,256], index: 6, kind: output, shape index: {1}]  }
   0x1   :  { %13 = vsyncpa [#allocation6], 0 }
   0x2   :  { %14 = vsyncpa [#allocation4], 0 }
   0x3   :  { %15 = vsyncpa [#allocation10], 0  ;;  %s816_s21 = smov [#allocation5]   ;;  %s698_s25 = scalar_lea.hbm %s992_s3, 8192 }
   0x4   :  { %s35_s22 = sshll.u32 %s816_s21, 4  ;;  %p699_p0 = scmp.ne.s32.totalorder %s992_s3, %s698_s25  ;;  %s36_s22 = int_to_ptr.vmem [resolvable:$true] %s35_s22 }
   0x5   :  { %p702_p1 = scmp.lt.u32.totalorder %s698_s25, %s992_s3 }
   0x7   :  { %p704_p2 = pnand %p702_p1, %p699_p0 }
   0x9   :  { %707 = shalt.err (!%p704_p2)
}
   0xa   :  { %s708_s30 = scalar_lea.vmem %s36_s22, 8192  ;;  %p713_p4 = scmp.lt.s32.totalorder %s36_s22, %s36_s22 }
   0xb   :  { %p709_p3 = scmp.ne.s32.totalorder %s36_s22, %s708_s30  ;;  %p714_p5 = scmp.lt.s32.totalorder %s708_s30, %s708_s30 }
   0xd   :  { %p715_p6 = por %p714_p5, %p713_p4 }
   0xf   :  { %p716_p7 = pnand %p715_p6, %p709_p3 }
  0x11   :  { %719 = shalt.err (!%p716_p7)
}
  0x12   :  { %s817_s7 = smov 256   ;;  %s818_s8 = smov 16  }
  0x13   :  { %41 = dma.hbm_to_vmem [thread:$0]  %s992_s3, 8192, %s36_s22, [#allocation6], %s817_s7, %s817_s7, %s818_s8  }
  0x14   :  { %s819_s11 = smov [#allocation2]   ;;  %s820_s13 = smov [#allocation7]  }
  0x15   :  { %s22_s12 = sshll.u32 %s819_s11, 4  ;;  %s47_s14 = sshll.u32 %s820_s13, 4  ;;  %s23_s12 = int_to_ptr.vmem [resolvable:$true] %s22_s12  ;;  %s48_s14 = int_to_ptr.vmem [resolvable:$true] %s47_s14 }
  0x16   :  { %s720_s17 = scalar_lea.hbm %s989_s0, 256 }
  0x17   :  { %p721_p8 = scmp.ne.s32.totalorder %s989_s0, %s720_s17  ;;  %p724_p9 = scmp.lt.u32.totalorder %s720_s17, %s989_s0 }
  0x19   :  { %p726_p10 = pnand %p724_p9, %p721_p8 }
  0x1b   :  { %729 = shalt.err (!%p726_p10)
}
  0x1c   :  { %s730_s3 = scalar_lea.vmem %s23_s12, 256  ;;  %p735_p12 = scmp.lt.s32.totalorder %s23_s12, %s23_s12 }
  0x1d   :  { %p731_p11 = scmp.ne.s32.totalorder %s23_s12, %s730_s3  ;;  %p736_p13 = scmp.lt.s32.totalorder %s730_s3, %s730_s3 }
  0x1f   :  { %p737_p0 = por %p736_p13, %p735_p12 }
  0x21   :  { %p738_p1 = pnand %p737_p0, %p731_p11 }
  0x23   :  { %741 = shalt.err (!%p738_p1)
}
  0x24   :  { %25 = dma.hbm_to_vmem [thread:$0]  %s989_s0, 256, %s23_s12, [#allocation3]  }
  0x25   :  { %s742_s26 = scalar_lea.hbm %s993_s4, 8192 }
  0x26   :  { %p743_p2 = scmp.ne.s32.totalorder %s993_s4, %s742_s26  ;;  %p746_p3 = scmp.lt.u32.totalorder %s742_s26, %s993_s4 }
  0x28   :  { %p748_p4 = pnand %p746_p3, %p743_p2 }
  0x2a   :  { %751 = shalt.err (!%p748_p4)
}
  0x2b   :  { %s752_s9 = scalar_lea.vmem %s48_s14, 8192  ;;  %p757_p6 = scmp.lt.s32.totalorder %s48_s14, %s48_s14 }
  0x2c   :  { %p753_p5 = scmp.ne.s32.totalorder %s48_s14, %s752_s9  ;;  %p758_p7 = scmp.lt.s32.totalorder %s752_s9, %s752_s9 }
  0x2e   :  { %p759_p8 = por %p758_p7, %p757_p6 }
  0x30   :  { %p760_p9 = pnand %p759_p8, %p753_p5 }
  0x32   :  { %763 = shalt.err (!%p760_p9)
}
  0x33   :  { %53 = dma.hbm_to_vmem [thread:$0]  %s993_s4, 8192, %s48_s14, [#allocation6], %s817_s7, %s817_s7, %s818_s8  }
  0x34   :  { %808 = dma.done.wait [#allocation3], 256  }
  0x35   :  { %809 = vsyncadd [#allocation3], 4294967040 }
  0x36   :  { %810 = dma.done.wait [#allocation6], 16384  }
  0x37   :  { %811 = vsyncadd [#allocation6], 4294950912  ;;  %v821_v0 = vmov 0.0   ;;  %v822_v1 = vmov 0   ;;  %v65_v2 = vld [vmem:[#allocation2 + $0x8] sm:$0xff]  ;;  %v64_v3 = vld [vmem:[#allocation2] sm:$0xff] }
  0x38   :  { %140 = vmatprep.mubr.f32.mxu0 %v821_v0  ;;  %685 = vset.pattern.permute.xlu0 %v822_v1  ;;  %v63_v4 = vld [vmem:[%s990_s1] sm:$0xff]  ;;  %vm72_vm0 = vcmask 64512   ;;  %v148_v6 = vld [vmem:[#allocation5 + $0x8] sm:$0xff]  ;;  %v150_v7 = vld [vmem:[#allocation5 + $0x18] sm:$0xff]  ;;  %s823_s1 = smov [#allocation8]  }
  0x39   :  { %76 = vmatprep.subr.mxu0 %v65_v2  ;;  %v66_v5 = vld [vmem:[%s991_s2] sm:$0xff]  ;;  %v548_v8 = vpack.c.bf16 %v150_v7, %v148_v6  ;;  %v283_v9 = vld [vmem:[#allocation7 + $0x8] sm:$0xff]  ;;  %v285_v10 = vld [vmem:[#allocation7 + $0x18] sm:$0xff]  ;;  %s517_s2 = sshll.u32 %s823_s1, 4  ;;  %s518_s2 = int_to_ptr.vmem [resolvable:$true] %s517_s2 }
  0x3a   :  { %77 = vmatpush1.msra.mxu0 %v64_v3  ;;  %69 = vperm.xlu0 %685, %v66_v5   ;;  %v147_v11 = vld [vmem:[#allocation5] sm:$0xff]  ;;  %v612_v12 = vpack.c.bf16 %v285_v10, %v283_v9  ;;  %v149_v13 = vld [vmem:[#allocation5 + $0x10] sm:$0xff]  ;;  %v152_v18 = vld [vmem:[#allocation5 + $0x28] sm:$0xff]  ;;  %s764_s4 = scalar_lea.vmem %s518_s2, 256  ;;  %p769_p11 = scmp.lt.s32.totalorder %s518_s2, %s518_s2 }
  0x3b   :  { %541 = vmatmul.mubr.msk.f32.vlgmr.msra.gmra.mrb[0].mxu0 %vm72_vm0, %v63_v4  ;;  %v282_v14 = vld [vmem:[#allocation7] sm:$0xff]  ;;  %v284_v15 = vld [vmem:[#allocation7 + $0x10] sm:$0xff]  ;;  %549 = vmatprep.subr.bf16.mxu1 %v548_v8  ;;  %v550_v16 = vpack.c.bf16 %v149_v13, %v147_v11  ;;  %v154_v19 = vld [vmem:[#allocation5 + $0x38] sm:$0xff]  ;;  %p765_p10 = scmp.ne.s32.totalorder %s518_s2, %s764_s4  ;;  %p770_p12 = scmp.lt.s32.totalorder %s764_s4, %s764_s4 }
  0x3c   :  { %v614_v17 = vpack.c.bf16 %v284_v15, %v282_v14  ;;  %v287_v20 = vld [vmem:[#allocation7 + $0x28] sm:$0xff]  ;;  %613 = vmatprep.subr.bf16.mxu0 %v612_v12  ;;  %v552_v21 = vpack.c.bf16 %v154_v19, %v152_v18  ;;  %v289_v22 = vld [vmem:[#allocation7 + $0x38] sm:$0xff]  ;;  %v151_v23 = vld [vmem:[#allocation5 + $0x20] sm:$0xff] }
  0x3d   :  { %v153_v24 = vld [vmem:[#allocation5 + $0x30] sm:$0xff]  ;;  %551 = vmatpush1.bf16.msra.mxu1 %v550_v16  ;;  %v616_v25 = vpack.c.bf16 %v289_v22, %v287_v20  ;;  %v286_v27 = vld [vmem:[#allocation7 + $0x20] sm:$0xff]  ;;  %v156_v29 = vld [vmem:[#allocation5 + $0x48] sm:$0xff]  ;;  %p771_p13 = por %p770_p12, %p769_p11 }
  0x3e   :  { %615 = vmatpush1.bf16.msra.mxu0 %v614_v17  ;;  %v554_v26 = vpack.c.bf16 %v153_v24, %v151_v23  ;;  %v288_v28 = vld [vmem:[#allocation7 + $0x30] sm:$0xff]  ;;  %553 = vmatprep.subr.bf16.mxu1 %v552_v21  ;;  %v158_v31 = vld [vmem:[#allocation5 + $0x58] sm:$0xff]  ;;  %v291_v32 = vld [vmem:[#allocation7 + $0x48] sm:$0xff] }
  0x3f   :  { %v618_v30 = vpack.c.bf16 %v288_v28, %v286_v27  ;;  %v293_v33 = vld [vmem:[#allocation7 + $0x58] sm:$0xff]  ;;  %617 = vmatprep.subr.bf16.mxu0 %v616_v25  ;;  %v556_v34 = vpack.c.bf16 %v158_v31, %v156_v29  ;;  %v155_v36 = vld [vmem:[#allocation5 + $0x40] sm:$0xff]  ;;  %v157_v37 = vld [vmem:[#allocation5 + $0x50] sm:$0xff]  ;;  %p772_p0 = pnand %p771_p13, %p765_p10 }
  0x40   :  { %v620_v35 = vpack.c.bf16 %v293_v33, %v291_v32  ;;  %v290_v38 = vld [vmem:[#allocation7 + $0x40] sm:$0xff]  ;;  %v292_v39 = vld [vmem:[#allocation7 + $0x50] sm:$0xff]  ;;  %v160_v40 = vld [vmem:[#allocation5 + $0x68] sm:$0xff]  ;;  %v558_v42 = vpack.c.bf16 %v157_v37, %v155_v36 }
  0x41   :  { %v162_v41 = vld [vmem:[#allocation5 + $0x78] sm:$0xff]  ;;  %555 = vmatpush1.bf16.msra.mxu1 %v554_v26  ;;  %v622_v43 = vpack.c.bf16 %v292_v39, %v290_v38  ;;  %v295_v44 = vld [vmem:[#allocation7 + $0x68] sm:$0xff]  ;;  %v159_v46 = vld [vmem:[#allocation5 + $0x60] sm:$0xff] }
  0x42   :  { %619 = vmatpush1.bf16.msra.mxu0 %v618_v30  ;;  %v297_v45 = vld [vmem:[#allocation7 + $0x78] sm:$0xff]  ;;  %557 = vmatprep.subr.bf16.mxu1 %v556_v34  ;;  %v560_v47 = vpack.c.bf16 %v162_v41, %v160_v40  ;;  %v161_v49 = vld [vmem:[#allocation5 + $0x70] sm:$0xff]  ;;  %v294_v50 = vld [vmem:[#allocation7 + $0x60] sm:$0xff] }
  0x43   :  { %621 = vmatprep.subr.bf16.mxu0 %v620_v35  ;;  %v624_v48 = vpack.c.bf16 %v297_v45, %v295_v44  ;;  %v296_v51 = vld [vmem:[#allocation7 + $0x70] sm:$0xff]  ;;  %v164_v52 = vld [vmem:[#allocation5 + $0x88] sm:$0xff]  ;;  %v166_v53 = vld [vmem:[#allocation5 + $0x98] sm:$0xff]  ;;  %v562_v56 = vpack.c.bf16 %v161_v49, %v159_v46 }
  0x44   :  { %v299_v54 = vld [vmem:[#allocation7 + $0x88] sm:$0xff]  ;;  %v301_v55 = vld [vmem:[#allocation7 + $0x98] sm:$0xff]  ;;  %v626_v57 = vpack.c.bf16 %v296_v51, %v294_v50  ;;  %v163_v58 = vld [vmem:[#allocation5 + $0x80] sm:$0xff]  ;;  %v564_v60 = vpack.c.bf16 %v166_v53, %v164_v52 }
  0x45   :  { %559 = vmatpush1.bf16.msra.mxu1 %v558_v42  ;;  %v165_v59 = vld [vmem:[#allocation5 + $0x90] sm:$0xff]  ;;  %v628_v61 = vpack.c.bf16 %v301_v55, %v299_v54  ;;  %v298_v62 = vld [vmem:[#allocation7 + $0x80] sm:$0xff]  ;;  %v168_v1 = vld [vmem:[#allocation5 + $0xa8] sm:$0xff] }
  0x46   :  { %623 = vmatpush1.bf16.msra.mxu0 %v622_v43  ;;  %561 = vmatprep.subr.bf16.mxu1 %v560_v47  ;;  %v300_v63 = vld [vmem:[#allocation7 + $0x90] sm:$0xff]  ;;  %v170_v2 = vld [vmem:[#allocation5 + $0xb8] sm:$0xff]  ;;  %v303_v3 = vld [vmem:[#allocation7 + $0xa8] sm:$0xff]  ;;  %v566_v5 = vpack.c.bf16 %v165_v59, %v163_v58 }
  0x47   :  { %625 = vmatprep.subr.bf16.mxu0 %v624_v48  ;;  %v305_v4 = vld [vmem:[#allocation7 + $0xb8] sm:$0xff]  ;;  %v630_v6 = vpack.c.bf16 %v300_v63, %v298_v62  ;;  %v167_v7 = vld [vmem:[#allocation5 + $0xa0] sm:$0xff]  ;;  %v169_v8 = vld [vmem:[#allocation5 + $0xb0] sm:$0xff]  ;;  %v568_v9 = vpack.c.bf16 %v170_v2, %v168_v1 }
  0x48   :  { %v632_v10 = vpack.c.bf16 %v305_v4, %v303_v3  ;;  %v302_v11 = vld [vmem:[#allocation7 + $0xa0] sm:$0xff]  ;;  %v304_v12 = vld [vmem:[#allocation7 + $0xb0] sm:$0xff]  ;;  %v172_v13 = vld [vmem:[#allocation5 + $0xc8] sm:$0xff]  ;;  %v570_v17 = vpack.c.bf16 %v169_v8, %v167_v7 }
  0x49   :  { %563 = vmatpush1.bf16.msra.mxu1 %v562_v56  ;;  %v174_v14 = vld [vmem:[#allocation5 + $0xd8] sm:$0xff]  ;;  %v307_v15 = vld [vmem:[#allocation7 + $0xc8] sm:$0xff]  ;;  %v634_v18 = vpack.c.bf16 %v304_v12, %v302_v11  ;;  %v171_v19 = vld [vmem:[#allocation5 + $0xc0] sm:$0xff] }
  0x4a   :  { %627 = vmatpush1.bf16.msra.mxu0 %v626_v57  ;;  %565 = vmatprep.subr.bf16.mxu1 %v564_v60  ;;  %v309_v16 = vld [vmem:[#allocation7 + $0xd8] sm:$0xff]  ;;  %v173_v20 = vld [vmem:[#allocation5 + $0xd0] sm:$0xff]  ;;  %v572_v21 = vpack.c.bf16 %v174_v14, %v172_v13  ;;  %v306_v23 = vld [vmem:[#allocation7 + $0xc0] sm:$0xff] }
  0x4b   :  { %629 = vmatprep.subr.bf16.mxu0 %v628_v61  ;;  %v636_v22 = vpack.c.bf16 %v309_v16, %v307_v15  ;;  %v308_v24 = vld [vmem:[#allocation7 + $0xd0] sm:$0xff]  ;;  %v176_v25 = vld [vmem:[#allocation5 + $0xe8] sm:$0xff]  ;;  %v178_v26 = vld [vmem:[#allocation5 + $0xf8] sm:$0xff]  ;;  %v574_v29 = vpack.c.bf16 %v173_v20, %v171_v19 }
  0x4c   :  { %v311_v27 = vld [vmem:[#allocation7 + $0xe8] sm:$0xff]  ;;  %v313_v28 = vld [vmem:[#allocation7 + $0xf8] sm:$0xff]  ;;  %v638_v30 = vpack.c.bf16 %v308_v24, %v306_v23  ;;  %v175_v31 = vld [vmem:[#allocation5 + $0xe0] sm:$0xff]  ;;  %v576_v33 = vpack.c.bf16 %v178_v26, %v176_v25 }
  0x4d   :  { %567 = vmatpush1.bf16.msra.mxu1 %v566_v5  ;;  %v177_v32 = vld [vmem:[#allocation5 + $0xf0] sm:$0xff]  ;;  %v640_v34 = vpack.c.bf16 %v313_v28, %v311_v27  ;;  %v310_v35 = vld [vmem:[#allocation7 + $0xe0] sm:$0xff]  ;;  %v180_v37 = vld [vmem:[#allocation5 + $0x108] sm:$0xff] }
  0x4e   :  { %631 = vmatpush1.bf16.msra.mxu0 %v630_v6  ;;  %569 = vmatprep.subr.bf16.mxu1 %v568_v9  ;;  %v312_v36 = vld [vmem:[#allocation7 + $0xf0] sm:$0xff]  ;;  %v182_v38 = vld [vmem:[#allocation5 + $0x118] sm:$0xff]  ;;  %v315_v39 = vld [vmem:[#allocation7 + $0x108] sm:$0xff]  ;;  %v578_v41 = vpack.c.bf16 %v177_v32, %v175_v31 }
  0x4f   :  { %633 = vmatprep.subr.bf16.mxu0 %v632_v10  ;;  %v317_v40 = vld [vmem:[#allocation7 + $0x118] sm:$0xff]  ;;  %v642_v42 = vpack.c.bf16 %v312_v36, %v310_v35  ;;  %v179_v43 = vld [vmem:[#allocation5 + $0x100] sm:$0xff]  ;;  %v181_v44 = vld [vmem:[#allocation5 + $0x110] sm:$0xff]  ;;  %v580_v45 = vpack.c.bf16 %v182_v38, %v180_v37 }
  0x50   :  { %v644_v46 = vpack.c.bf16 %v317_v40, %v315_v39  ;;  %v314_v47 = vld [vmem:[#allocation7 + $0x100] sm:$0xff]  ;;  %v316_v48 = vld [vmem:[#allocation7 + $0x110] sm:$0xff]  ;;  %v184_v49 = vld [vmem:[#allocation5 + $0x128] sm:$0xff]  ;;  %v582_v53 = vpack.c.bf16 %v181_v44, %v179_v43 }
  0x51   :  { %571 = vmatpush1.bf16.msra.mxu1 %v570_v17  ;;  %v186_v50 = vld [vmem:[#allocation5 + $0x138] sm:$0xff]  ;;  %v319_v51 = vld [vmem:[#allocation7 + $0x128] sm:$0xff]  ;;  %v646_v54 = vpack.c.bf16 %v316_v48, %v314_v47  ;;  %v183_v55 = vld [vmem:[#allocation5 + $0x120] sm:$0xff] }
  0x52   :  { %635 = vmatpush1.bf16.msra.mxu0 %v634_v18  ;;  %573 = vmatprep.subr.bf16.mxu1 %v572_v21  ;;  %v321_v52 = vld [vmem:[#allocation7 + $0x138] sm:$0xff]  ;;  %v185_v56 = vld [vmem:[#allocation5 + $0x130] sm:$0xff]  ;;  %v584_v57 = vpack.c.bf16 %v186_v50, %v184_v49  ;;  %v318_v59 = vld [vmem:[#allocation7 + $0x120] sm:$0xff] }
  0x53   :  { %637 = vmatprep.subr.bf16.mxu0 %v636_v22  ;;  %v648_v58 = vpack.c.bf16 %v321_v52, %v319_v51  ;;  %v320_v60 = vld [vmem:[#allocation7 + $0x130] sm:$0xff]  ;;  %v188_v61 = vld [vmem:[#allocation5 + $0x148] sm:$0xff]  ;;  %v190_v62 = vld [vmem:[#allocation5 + $0x158] sm:$0xff]  ;;  %v586_v2 = vpack.c.bf16 %v185_v56, %v183_v55 }
  0x54   :  { %v323_v63 = vld [vmem:[#allocation7 + $0x148] sm:$0xff]  ;;  %v325_v1 = vld [vmem:[#allocation7 + $0x158] sm:$0xff]  ;;  %v650_v3 = vpack.c.bf16 %v320_v60, %v318_v59  ;;  %v187_v4 = vld [vmem:[#allocation5 + $0x140] sm:$0xff]  ;;  %v588_v6 = vpack.c.bf16 %v190_v62, %v188_v61 }
  0x55   :  { %575 = vmatpush1.bf16.msra.mxu1 %v574_v29  ;;  %v189_v5 = vld [vmem:[#allocation5 + $0x150] sm:$0xff]  ;;  %v652_v7 = vpack.c.bf16 %v325_v1, %v323_v63  ;;  %v322_v8 = vld [vmem:[#allocation7 + $0x140] sm:$0xff]  ;;  %v192_v10 = vld [vmem:[#allocation5 + $0x168] sm:$0xff] }
  0x56   :  { %639 = vmatpush1.bf16.msra.mxu0 %v638_v30  ;;  %577 = vmatprep.subr.bf16.mxu1 %v576_v33  ;;  %v324_v9 = vld [vmem:[#allocation7 + $0x150] sm:$0xff]  ;;  %v194_v11 = vld [vmem:[#allocation5 + $0x178] sm:$0xff]  ;;  %v327_v12 = vld [vmem:[#allocation7 + $0x168] sm:$0xff]  ;;  %v590_v14 = vpack.c.bf16 %v189_v5, %v187_v4 }
  0x57   :  { %641 = vmatprep.subr.bf16.mxu0 %v640_v34  ;;  %v329_v13 = vld [vmem:[#allocation7 + $0x178] sm:$0xff]  ;;  %v654_v15 = vpack.c.bf16 %v324_v9, %v322_v8  ;;  %v191_v16 = vld [vmem:[#allocation5 + $0x160] sm:$0xff]  ;;  %v193_v17 = vld [vmem:[#allocation5 + $0x170] sm:$0xff]  ;;  %v592_v18 = vpack.c.bf16 %v194_v11, %v192_v10 }
  0x58   :  { %v656_v19 = vpack.c.bf16 %v329_v13, %v327_v12  ;;  %v326_v20 = vld [vmem:[#allocation7 + $0x160] sm:$0xff]  ;;  %v328_v21 = vld [vmem:[#allocation7 + $0x170] sm:$0xff]  ;;  %v196_v22 = vld [vmem:[#allocation5 + $0x188] sm:$0xff]  ;;  %v594_v26 = vpack.c.bf16 %v193_v17, %v191_v16 }
  0x59   :  { %579 = vmatpush1.bf16.msra.mxu1 %v578_v41  ;;  %v198_v23 = vld [vmem:[#allocation5 + $0x198] sm:$0xff]  ;;  %v331_v24 = vld [vmem:[#allocation7 + $0x188] sm:$0xff]  ;;  %v658_v27 = vpack.c.bf16 %v328_v21, %v326_v20  ;;  %v195_v28 = vld [vmem:[#allocation5 + $0x180] sm:$0xff] }
  0x5a   :  { %643 = vmatpush1.bf16.msra.mxu0 %v642_v42  ;;  %581 = vmatprep.subr.bf16.mxu1 %v580_v45  ;;  %v333_v25 = vld [vmem:[#allocation7 + $0x198] sm:$0xff]  ;;  %v197_v29 = vld [vmem:[#allocation5 + $0x190] sm:$0xff]  ;;  %v596_v30 = vpack.c.bf16 %v198_v23, %v196_v22  ;;  %v330_v32 = vld [vmem:[#allocation7 + $0x180] sm:$0xff] }
  0x5b   :  { %645 = vmatprep.subr.bf16.mxu0 %v644_v46  ;;  %v660_v31 = vpack.c.bf16 %v333_v25, %v331_v24  ;;  %v332_v33 = vld [vmem:[#allocation7 + $0x190] sm:$0xff]  ;;  %v200_v34 = vld [vmem:[#allocation5 + $0x1a8] sm:$0xff]  ;;  %v202_v35 = vld [vmem:[#allocation5 + $0x1b8] sm:$0xff]  ;;  %v598_v38 = vpack.c.bf16 %v197_v29, %v195_v28 }
  0x5c   :  { %v335_v36 = vld [vmem:[#allocation7 + $0x1a8] sm:$0xff]  ;;  %v337_v37 = vld [vmem:[#allocation7 + $0x1b8] sm:$0xff]  ;;  %v662_v39 = vpack.c.bf16 %v332_v33, %v330_v32  ;;  %v199_v40 = vld [vmem:[#allocation5 + $0x1a0] sm:$0xff]  ;;  %v600_v42 = vpack.c.bf16 %v202_v35, %v200_v34 }
  0x5d   :  { %583 = vmatpush1.bf16.msra.mxu1 %v582_v53  ;;  %v201_v41 = vld [vmem:[#allocation5 + $0x1b0] sm:$0xff]  ;;  %v664_v43 = vpack.c.bf16 %v337_v37, %v335_v36  ;;  %v334_v44 = vld [vmem:[#allocation7 + $0x1a0] sm:$0xff]  ;;  %v204_v46 = vld [vmem:[#allocation5 + $0x1c8] sm:$0xff] }
  0x5e   :  { %647 = vmatpush1.bf16.msra.mxu0 %v646_v54  ;;  %585 = vmatprep.subr.bf16.mxu1 %v584_v57  ;;  %v336_v45 = vld [vmem:[#allocation7 + $0x1b0] sm:$0xff]  ;;  %v206_v47 = vld [vmem:[#allocation5 + $0x1d8] sm:$0xff]  ;;  %v339_v48 = vld [vmem:[#allocation7 + $0x1c8] sm:$0xff]  ;;  %v602_v50 = vpack.c.bf16 %v201_v41, %v199_v40 }
  0x5f   :  { %649 = vmatprep.subr.bf16.mxu0 %v648_v58  ;;  %v341_v49 = vld [vmem:[#allocation7 + $0x1d8] sm:$0xff]  ;;  %v666_v51 = vpack.c.bf16 %v336_v45, %v334_v44  ;;  %v203_v52 = vld [vmem:[#allocation5 + $0x1c0] sm:$0xff]  ;;  %v604_v53 = vpack.c.bf16 %v206_v47, %v204_v46  ;;  %v205_v55 = vld [vmem:[#allocation5 + $0x1d0] sm:$0xff] }
  0x60   :  { %v668_v54 = vpack.c.bf16 %v341_v49, %v339_v48  ;;  %v338_v56 = vld [vmem:[#allocation7 + $0x1c0] sm:$0xff]  ;;  %v340_v57 = vld [vmem:[#allocation7 + $0x1d0] sm:$0xff]  ;;  %v606_v58 = vpack.c.bf16 %v205_v55, %v203_v52  ;;  %v208_v60 = vld [vmem:[#allocation5 + $0x1e8] sm:$0xff] }
  0x61   :  { %587 = vmatpush1.bf16.msra.mxu1 %v586_v2  ;;  %v670_v59 = vpack.c.bf16 %v340_v57, %v338_v56  ;;  %v210_v61 = vld [vmem:[#allocation5 + $0x1f8] sm:$0xff]  ;;  %v343_v62 = vld [vmem:[#allocation7 + $0x1e8] sm:$0xff]  ;;  %v207_v2 = vld [vmem:[#allocation5 + $0x1e0] sm:$0xff] }
  0x62   :  { %651 = vmatpush1.bf16.msra.mxu0 %v650_v3  ;;  %589 = vmatprep.subr.bf16.mxu1 %v588_v6  ;;  %v608_v63 = vpack.c.bf16 %v210_v61, %v208_v60  ;;  %v345_v1 = vld [vmem:[#allocation7 + $0x1f8] sm:$0xff]  ;;  %v209_v3 = vld [vmem:[#allocation5 + $0x1f0] sm:$0xff]  ;;  %v342_v6 = vld [vmem:[#allocation7 + $0x1e0] sm:$0xff] }
  0x63   :  { %653 = vmatprep.subr.bf16.mxu0 %v652_v7  ;;  %v672_v4 = vpack.c.bf16 %v345_v1, %v343_v62  ;;  %v610_v5 = vpack.c.bf16 %v209_v3, %v207_v2  ;;  %v344_v7 = vld [vmem:[#allocation7 + $0x1f0] sm:$0xff] }
  0x64   :  { %v674_v8 = vpack.c.bf16 %v344_v7, %v342_v6 }
  0x65   :  { %591 = vmatpush1.bf16.msra.mxu1 %v590_v14 }
  0x66   :  { %655 = vmatpush1.bf16.msra.mxu0 %v654_v15  ;;  %593 = vmatprep.subr.bf16.mxu1 %v592_v18 }
  0x67   :  { %657 = vmatprep.subr.bf16.mxu0 %v656_v19 }
  0x69   :  { %595 = vmatpush1.bf16.msra.mxu1 %v594_v26 }
  0x6a   :  { %659 = vmatpush1.bf16.msra.mxu0 %v658_v27  ;;  %597 = vmatprep.subr.bf16.mxu1 %v596_v30 }
  0x6b   :  { %661 = vmatprep.subr.bf16.mxu0 %v660_v31 }
  0x6d   :  { %599 = vmatpush1.bf16.msra.mxu1 %v598_v38 }
  0x6e   :  { %663 = vmatpush1.bf16.msra.mxu0 %v662_v39  ;;  %601 = vmatprep.subr.bf16.mxu1 %v600_v42 }
  0x6f   :  { %665 = vmatprep.subr.bf16.mxu0 %v664_v43 }
  0x71   :  { %603 = vmatpush1.bf16.msra.mxu1 %v602_v50 }
  0x72   :  { %667 = vmatpush1.bf16.msra.mxu0 %v666_v51  ;;  %605 = vmatprep.subr.bf16.mxu1 %v604_v53 }
  0x73   :  { %669 = vmatprep.subr.bf16.mxu0 %v668_v54 }
  0x75   :  { %607 = vmatpush1.bf16.msra.mxu1 %v606_v58 }
  0x76   :  { %671 = vmatpush1.bf16.msra.mxu0 %v670_v59  ;;  %609 = vmatprep.subr.bf16.mxu1 %v608_v63 }
  0x77   :  { %673 = vmatprep.subr.bf16.mxu0 %v672_v4 }
  0x79   :  { %611 = vmatpush1.bf16.msra.mxu1 %v610_v5 }
  0x7a   :  { %675 = vmatpush1.bf16.msra.mxu0 %v674_v8 }
  0xb9   :  { %v70_v9 = vpop.permute.xlu0 %69 }
 0x10e   :  { %v142_v10 = vpop.f32.mrb[0].mxu0 }
 0x10f   :  { %v144_v11 = vpop.f32.mrb[1].mxu0  ;;  %v143_v13 = vadd.f32 %v142_v10, %v70_v9 }
 0x110   :  { %v145_v12 = vadd.f32 %v144_v11, %v70_v9 }
 0x112   :  { %275 = vmatprep.mubr.f32.mxu1 %v145_v12  ;;  %410 = vmatprep.mubr.f32.mxu0 %v145_v12 }
 0x113   :  { %276 = vmatmul.mubr.f32.vlgmr.msra.gmra.mrb[0].mxu1 %v143_v13  ;;  %411 = vmatmul.mubr.f32.vlgmr.msra.gmra.mrb[2].mxu0 %v143_v13 }
 0x1e6   :  { %v909_v14 = vpop.f32.mrb[0].mxu1  ;;  %v911_v15 = vpop.f32.mrb[2].mxu0 }
 0x1e7   :  { %v417_v16 = vmul.f32 %v909_v14, %v909_v14  ;;  %v916_v17 = vand.u32 2147483647, %v909_v14  ;;  %v419_v18 = vmul.f32 %v911_v15, %v911_v15  ;;  %v920_v19 = vpop.f32.mrb[1].mxu1  ;;  %v922_v20 = vpop.f32.mrb[3].mxu0  ;;  %v925_v21 = vand.u32 2147483647, %v911_v15 }
 0x1e8   :  { %v418_v22 = vmul.f32 %v920_v19, %v920_v19  ;;  %v930_v23 = vand.u32 2147483647, %v920_v19  ;;  %v420_v25 = vmul.f32 %v922_v20, %v922_v20  ;;  %v935_v26 = vand.u32 2147483647, %v922_v20 }
 0x1e9   :  { %v421_v24 = vadd.f32 %v419_v18, %v417_v16  ;;  %v443_v27 = vmin.f32 %v925_v21, %v916_v17  ;;  %v445_v28 = vmax.f32 %v925_v21, %v916_v17  ;;  %vm491_vm1 = vcmp.gt.f32.partialorder %v925_v21, %v916_v17 }
 0x1ea   :  { %v422_v29 = vadd.f32 %v420_v25, %v418_v22  ;;  %v444_v30 = vmin.f32 %v935_v26, %v930_v23  ;;  %v446_v31 = vmax.f32 %v935_v26, %v930_v23  ;;  %vm492_vm2 = vcmp.gt.f32.partialorder %v935_v26, %v930_v23 }
 0x1eb   :  { %vm447_vm3 = vcmp.eq.f32.partialorder %v445_v28, 0.0  ;;  %686 = vrsqrt.f32 %v421_v24  ;;  %vm425_vm5 = vcmp.eq.f32.partialorder %v421_v24, inf  ;;  %vm427_vm6 = vcmp.eq.f32.partialorder %v421_v24, 0.0 }
 0x1ec   :  { %v449_v32 = vsel %vm447_vm3, 1.0, %v445_v28  ;;  %688 = vrsqrt.f32 %v422_v29  ;;  %vm448_vm4 = vcmp.eq.f32.partialorder %v446_v31, 0.0  ;;  %v428_v38 = vand.u32 2147483648, %v421_v24 }
 0x1ed   :  { %690 = vrcp.f32 %v449_v32  ;;  %v450_v33 = vsel %vm448_vm4, 1.0, %v446_v31  ;;  %vm432_vm7 = vcmp.eq.f32.partialorder %v422_v29, inf  ;;  %v435_v43 = vand.u32 2147483648, %v422_v29 }
 0x1ee   :  { %692 = vrcp.f32 %v450_v33  ;;  %vm434_vm8 = vcmp.eq.f32.partialorder %v422_v29, 0.0 }
 0x1f5   :  { %v687_v34 = vpop.eup %686 }
 0x1f6   :  { %v689_v35 = vpop.eup %688  ;;  %v424_v36 = vmul.f32 %v687_v34, %v421_v24 }
 0x1f7   :  { %v691_v37 = vpop.eup %690  ;;  %v431_v39 = vmul.f32 %v689_v35, %v422_v29 }
 0x1f8   :  { %v693_v40 = vpop.eup %692  ;;  %v453_v41 = vmul.f32 %v691_v37, %v443_v27  ;;  %v426_v42 = vsel %vm425_vm5, %v421_v24, %v424_v36 }
 0x1f9   :  { %v454_v44 = vmul.f32 %v693_v40, %v444_v30  ;;  %v429_v45 = vsel %vm427_vm6, %v428_v38, %v426_v42  ;;  %v433_v46 = vsel %vm432_vm7, %v422_v29, %v431_v39 }
 0x1fa   :  { %v459_v47 = vadd.f32 1.0, %v453_v41  ;;  %v436_v48 = vsel %vm434_vm8, %v435_v43, %v433_v46  ;;  %437 = vst [vmem:[#allocation8] sm:$0xff] %v429_v45 }
 0x1fb   :  { %v460_v49 = vadd.f32 1.0, %v454_v44  ;;  %438 = vst [vmem:[#allocation8 + $0x8] sm:$0xff] %v436_v48 }
 0x1fc   :  { %694 = vrcp.f32 %v459_v47 }
 0x1fd   :  { %775 = shalt.err (!%p772_p0)
}
 0x1fe   :  { %s776_s14 = scalar_lea.hbm %s994_s5, 256 }
 0x1ff   :  { %p777_p1 = scmp.ne.s32.totalorder %s994_s5, %s776_s14  ;;  %p780_p2 = scmp.lt.u32.totalorder %s776_s14, %s994_s5 }
 0x201   :  { %p782_p3 = pnand %p780_p2, %p777_p1 }
 0x203   :  { %785 = shalt.err (!%p782_p3)
}
 0x204   :  { %520 = dma.vmem_to_hbm [thread:$0]  %s518_s2, 256, %s994_s5, [#allocation4]   ;;  %696 = vrcp.f32 %v460_v49  ;;  %v542_v50 = vadd.f32 -1.0, %v453_v41  ;;  %v543_v52 = vadd.f32 -1.0, %v454_v44  ;;  %vm455_vm9 = vcmp.gt.f32.partialorder %v453_v41, 0.41421357 }
 0x205   :  { %vm456_vm10 = vcmp.gt.f32.partialorder %v454_v44, 0.41421357  ;;  %v467_v11 = vsel %vm455_vm9, 0.7853982, %v821_v0  ;;  %vm497_vm11 = vcmp.lt.f32.partialorder %v909_v14, 0.0  ;;  %vm498_vm12 = vcmp.lt.f32.partialorder %v920_v19, 0.0 }
 0x206   :  { %v695_v51 = vpop.eup %694  ;;  %v468_v12 = vsel %vm456_vm10, 0.7853982, %v821_v0  ;;  %s824_s5 = smov [#allocation9]   ;;  %vm503_vm13 = vcmp.lt.f32.partialorder %v911_v15, 0.0  ;;  %vm504_vm14 = vcmp.lt.f32.partialorder %v922_v20, 0.0 }
 0x207   :  { %v463_v54 = vmul.f32 %v695_v51, %v542_v50  ;;  %s527_s3 = sshll.u32 %s824_s5, 4  ;;  %s528_s3 = int_to_ptr.vmem [resolvable:$true] %s527_s3 }
 0x208   :  { %s786_s22 = scalar_lea.vmem %s528_s3, 256  ;;  %p791_p5 = scmp.lt.s32.totalorder %s528_s3, %s528_s3 }
 0x209   :  { %v465_v56 = vsel %vm455_vm9, %v463_v54, %v453_v41  ;;  %p787_p4 = scmp.ne.s32.totalorder %s528_s3, %s786_s22  ;;  %p792_p6 = scmp.lt.s32.totalorder %s786_s22, %s786_s22 }
 0x20a   :  { %v469_v58 = vmul.f32 %v465_v56, %v465_v56  ;;  %v483_v13 = vadd.f32 %v467_v11, %v465_v56 }
 0x20b   :  { %p793_p7 = por %p792_p6, %p791_p5 }
 0x20c   :  { %v471_v60 = vmul.f32 0.080537446, %v469_v58  ;;  %v485_v8 = vmul.f32 %v469_v58, %v465_v56 }
 0x20d   :  { %p794_p8 = pnand %p793_p7, %p787_p4 }
 0x20e   :  { %v697_v53 = vpop.eup %696  ;;  %v544_v62 = vadd.f32 -0.13877685, %v471_v60 }
 0x20f   :  { %v464_v55 = vmul.f32 %v697_v53, %v543_v52 }
 0x210   :  { %v475_v1 = vmul.f32 %v544_v62, %v469_v58 }
 0x211   :  { %v466_v57 = vsel %vm456_vm10, %v464_v55, %v454_v44 }
 0x212   :  { %v470_v59 = vmul.f32 %v466_v57, %v466_v57  ;;  %v477_v3 = vadd.f32 0.19977711, %v475_v1  ;;  %v484_v18 = vadd.f32 %v468_v12, %v466_v57 }
 0x214   :  { %v472_v61 = vmul.f32 0.080537446, %v470_v59  ;;  %v479_v5 = vmul.f32 %v477_v3, %v469_v58  ;;  %v486_v10 = vmul.f32 %v470_v59, %v466_v57 }
 0x216   :  { %v545_v63 = vadd.f32 -0.13877685, %v472_v61  ;;  %v546_v7 = vadd.f32 -0.3333295, %v479_v5 }
 0x218   :  { %v476_v2 = vmul.f32 %v545_v63, %v470_v59  ;;  %v487_v16 = vmul.f32 %v546_v7, %v485_v8 }
 0x21a   :  { %v478_v4 = vadd.f32 0.19977711, %v476_v2  ;;  %v489_v24 = vadd.f32 %v487_v16, %v483_v13 }
 0x21c   :  { %v480_v6 = vmul.f32 %v478_v4, %v470_v59  ;;  %v493_v27 = vsub.f32 1.5707964, %v489_v24 }
 0x21e   :  { %v547_v9 = vadd.f32 -0.3333295, %v480_v6  ;;  %v495_v29 = vsel %vm491_vm1, %v493_v27, %v489_v24 }
 0x21f   :  { %v499_v31 = vsub.f32 3.1415927, %v495_v29 }
 0x220   :  { %v488_v22 = vmul.f32 %v547_v9, %v486_v10 }
 0x221   :  { %v501_v32 = vsel %vm497_vm11, %v499_v31, %v495_v29 }
 0x222   :  { %v490_v25 = vadd.f32 %v488_v22, %v484_v18  ;;  %v505_v34 = vsub.f32 0.0, %v501_v32 }
 0x224   :  { %v494_v28 = vsub.f32 1.5707964, %v490_v25  ;;  %v507_v17 = vsel %vm503_vm13, %v505_v34, %v501_v32 }
 0x225   :  { %509 = vst [vmem:[#allocation9] sm:$0xff] %v507_v17 }
 0x226   :  { %v496_v30 = vsel %vm492_vm2, %v494_v28, %v490_v25 }
 0x227   :  { %v500_v0 = vsub.f32 3.1415927, %v496_v30 }
 0x229   :  { %v502_v33 = vsel %vm498_vm12, %v500_v0, %v496_v30 }
 0x22a   :  { %v506_v35 = vsub.f32 0.0, %v502_v33 }
 0x22c   :  { %v508_v21 = vsel %vm504_vm14, %v506_v35, %v502_v33 }
 0x22d   :  { %510 = vst [vmem:[#allocation9 + $0x8] sm:$0xff] %v508_v21 }
 0x22e   :  { %797 = shalt.err (!%p794_p8)
}
 0x22f   :  { %s798_s25 = scalar_lea.hbm %s995_s6, 256 }
 0x230   :  { %p799_p9 = scmp.ne.s32.totalorder %s995_s6, %s798_s25  ;;  %p802_p10 = scmp.lt.u32.totalorder %s798_s25, %s995_s6 }
 0x232   :  { %p804_p11 = pnand %p802_p10, %p799_p9 }
 0x234   :  { %807 = shalt.err (!%p804_p11)
}
 0x235   :  { %530 = dma.vmem_to_hbm [thread:$0]  %s528_s3, 256, %s995_s6, [#allocation10]  }
 0x236   :  { %812 = dma.done.wait [#allocation4], 256  }
 0x237   :  { %813 = vsyncadd [#allocation4], 4294967040 }
 0x238   :  { %814 = dma.done.wait [#allocation10], 256  }
 0x239   :  { %815 = vsyncadd [#allocation10], 4294967040 }
 0x23a   :  { %537 = vsyncpa [#allocation3], 1 }
 0x23b   :  { %538 = vsyncpa [#allocation6], 1 }
 0x23c   :  { %539 = vsyncpa [#allocation4], 1 }
 0x23d   :  { %540 = vsyncpa [#allocation10], 1 }

</bundles_post_ra>
